<compile_context>
chip_gen: v7x
topology: tpu7x:2x2x1
jax: 0.10.0
libtpu: 0.0.40
codegen_flags: <defaults>
</compile_context>

<pallas_src>
import functools
import math

import jax
import jax.numpy as jnp
from jax import lax
from jax.experimental import pallas as pl
from jax.experimental.pallas import tpu as pltpu


def _mhsa_kernel(gamma_ref, x_ref, wqkv_ref, bqkv_ref, maskT_ref, seg_ref,
                 segT_ref, o_ref, *, num_heads):
    # gamma_ref: (1, 1)      SMEM scalar
    # x_ref:     (L, C)      channel-last input for this batch
    # wqkv_ref:  (C, 3C)     packed, pre-transposed [Wq/sqrt(D) | Wk | Wv]
    # bqkv_ref:  (1, 3C)     packed bias [bq/sqrt(D) | bk | bv]
    # maskT_ref: (H*L, C)    block-diag head mask: 1 iff row j's head == channel c's head
    # seg_ref:   (H*L, H)    one-hot segment matrix (row j -> head j // L)
    # segT_ref:  (H, H*L)    its transpose (for broadcasting per-head scalars back)
    # o_ref:     (L, C)      output tile for this batch (heads concatenated on channels)
    x = x_ref[...]
    L, C = x.shape
    H = num_heads

    maskT = maskT_ref[...]
    seg = seg_ref[...]
    seg_t = segT_ref[...]

    # Conv1d(kernel_size=1) == per-position linear; one fused QKV matmul.
    qkv = jnp.dot(x, wqkv_ref[...], preferred_element_type=jnp.float32) + bqkv_ref[...]
    q = qkv[:, 0 * C:1 * C]          # already scaled by 1/sqrt(D)
    k = qkv[:, 1 * C:2 * C]
    v = qkv[:, 2 * C:3 * C]

    # Block-diagonal "big" K and V: row j = (h, m) holds k/v[m, :] masked to head h's
    # channels.  Sublane tiling + static mask; no transposes, no per-head slicing.
    k_big = jnp.concatenate([k] * H, axis=0) * maskT                 # (H*L, C)
    v_big = jnp.concatenate([v] * H, axis=0) * maskT                 # (H*L, C)

    # energy[l, h*L + m] = <q_h[l], k_h[m]>  — one lane-dense MXU push.
    energy = lax.dot_general(q, k_big, (((1,), (1,)), ((), ())),
                             preferred_element_type=jnp.float32)     # (L, H*L)

    # Segmented (per-head) numerically-stable softmax on the dense (L, H*L) tile.
    # Per-head maxima via small static lane-slice reductions (XLU; only the max path
    # is per-head), then broadcast back with one-hot matmuls so all element-wise work
    # stays on 128-lane-full vregs.
    m_seg = jnp.concatenate(
        [jnp.max(energy[:, h * L:(h + 1) * L], axis=-1, keepdims=True)
         for h in range(H)], axis=-1)                                # (L, H)
    m_full = jnp.dot(m_seg, seg_t, preferred_element_type=jnp.float32)   # (L, H*L)
    p = jnp.exp(energy - m_full)                                     # (L, H*L), dense
    s_seg = jnp.dot(p, seg, preferred_element_type=jnp.float32)      # (L, H)
    denom = jnp.dot(s_seg, seg_t, preferred_element_type=jnp.float32)    # (L, H*L)
    attn = p / denom                                                 # exact softmax

    # One (L, H*L) x (H*L, C) push directly yields the concatenated head outputs.
    out = jnp.dot(attn, v_big, preferred_element_type=jnp.float32)   # (L, C)

    gamma = gamma_ref[0, 0]
    o_ref[...] = gamma * out + x


def multi_head_self_attention(x, params, num_heads):
    """x: (B, C, L) float32, exactly like the PyTorch module input."""
    B, C, L = x.shape
    assert C % num_heads == 0, "channels must be divisible by num_heads"
    H = num_heads
    D = C // H
    scale = 1.0 / math.sqrt(D)

    wq, bq = params["wq"], params["bq"]   # (C, C), (C,)  (Conv1d weight squeezed)
    wk, bk = params["wk"], params["bk"]
    wv, bv = params["wv"], params["bv"]
    gamma = params["gamma"]               # (1,)

    # Pack + pre-transpose the 1x1-conv weights; fold the attention scale into the
    # query projection so the kernel never rescales the (L, H*L) energy tile.
    wqkv = jnp.concatenate([(wq * scale).T, wk.T, wv.T], axis=1)       # (C, 3C)
    bqkv = jnp.concatenate([bq * scale, bk, bv]).reshape(1, 3 * C)     # (1, 3C)
    gamma_2d = gamma.reshape(1, 1).astype(jnp.float32)

    # Static head-structure constants (precomputed once, resident in VMEM).
    row_head = jnp.arange(H * L, dtype=jnp.int32) // L                 # head of row j
    col_head = jnp.arange(C, dtype=jnp.int32) // D                     # head of channel c
    maskT = (row_head[:, None] == col_head[None, :]).astype(jnp.float32)   # (H*L, C)
    seg = (row_head[:, None] ==
           jnp.arange(H, dtype=jnp.int32)[None, :]).astype(jnp.float32)    # (H*L, H)
    seg_t = jnp.transpose(seg)                                             # (H, H*L)

    x_lc = jnp.transpose(x, (0, 2, 1))                                 # (B, L, C)

    kernel = functools.partial(_mhsa_kernel, num_heads=num_heads)

    out_lc = pl.pallas_call(
        kernel,
        out_shape=jax.ShapeDtypeStruct((B, L, C), jnp.float32),
        grid=(B,),
        in_specs=[
            pl.BlockSpec(memory_space=pltpu.MemorySpace.SMEM),         # gamma (1,1)
            pl.BlockSpec((None, L, C), lambda b: (b, 0, 0)),           # x, per batch
            pl.BlockSpec((C, 3 * C), lambda b: (0, 0)),                # packed W (resident)
            pl.BlockSpec((1, 3 * C), lambda b: (0, 0)),                # packed bias (resident)
            pl.BlockSpec((H * L, C), lambda b: (0, 0)),                # block-diag head mask
            pl.BlockSpec((H * L, H), lambda b: (0, 0)),                # segment one-hot
            pl.BlockSpec((H, H * L), lambda b: (0, 0)),                # segment one-hot^T
        ],
        out_specs=pl.BlockSpec((None, L, C), lambda b: (b, 0, 0)),
        compiler_params=pltpu.CompilerParams(
            dimension_semantics=("parallel",)),                        # B=2 -> both TCs on v7x
    )(gamma_2d, x_lc, wqkv, bqkv, maskT, seg, seg_t)

    # back to PyTorch's (B, C, L): out[b, h*D+d, l] = out_lc[b, l, h*D+d]
    return jnp.transpose(out_lc, (0, 2, 1))


def _reference(x, params, num_heads):
    """Pure-JAX transcription of the PyTorch forward (for validation)."""
    B, C, L = x.shape
    H, D = num_heads, C // num_heads

    def conv1(w, b):
        return jnp.einsum("oc,bcl->bol", w, x) + b[None, :, None]

    q = conv1(params["wq"], params["bq"]).reshape(B, H, D, L).transpose(0, 1, 3, 2)
    k = conv1(params["wk"], params["bk"]).reshape(B, H, D, L)
    v = conv1(params["wv"], params["bv"]).reshape(B, H, D, L)
    energy = jnp.matmul(q, k) / math.sqrt(D)
    attn = jax.nn.softmax(energy, axis=-1)
    out = jnp.matmul(attn, v.transpose(0, 1, 3, 2))
    out = out.transpose(0, 1, 3, 2).reshape(B, C, L)
    return params["gamma"].reshape(()) * out + x


if __name__ == "__main__":
    B, C, L = 2, 32, 16
    NUM_HEADS = 8

    key = jax.random.PRNGKey(0)
    kx, kwq, kbq, kwk, kbk, kwv, kbv = jax.random.split(key, 7)

    x = jax.random.normal(kx, (B, C, L), dtype=jnp.float32)

    w_scale = 1.0 / math.sqrt(C)
    params = {
        "wq": jax.random.normal(kwq, (C, C), jnp.float32) * w_scale,
        "bq": jax.random.normal(kbq, (C,), jnp.float32) * w_scale,
        "wk": jax.random.normal(kwk, (C, C), jnp.float32) * w_scale,
        "bk": jax.random.normal(kbk, (C,), jnp.float32) * w_scale,
        "wv": jax.random.normal(kwv, (C, C), jnp.float32) * w_scale,
        "bv": jax.random.normal(kbv, (C,), jnp.float32) * w_scale,
        # PyTorch inits gamma to 0.0; use 0.5 so the attention path is exercised.
        "gamma": jnp.array([0.5], dtype=jnp.float32),
    }

    out = multi_head_self_attention(x, params, NUM_HEADS)
    out = jax.block_until_ready(out)

    ref = _reference(x, params, NUM_HEADS)
    assert out.shape == (B, C, L)
    # Softmax uses an exact divide now; remaining differences are accumulation-order
    # level (~1e-6).  Tolerance kept with margin; structural errors would be O(1).
    assert jnp.allclose(out, ref, rtol=1e-3, atol=1e-3), (
        float(jnp.max(jnp.abs(out - ref))))

    print("KERNEL_OK")
</pallas_src>

<mosaic_0001>
module attributes {stable_mosaic.version = 11 : i64} {
  func.func @_mhsa_kernel(%arg0: i32, %arg1: memref<1x1xf32, #tpu.memory_space<smem>>, %arg2: memref<1x16x32xf32, #tpu.memory_space<vmem>>, %arg3: memref<32x96xf32, #tpu.memory_space<vmem>>, %arg4: memref<1x96xf32, #tpu.memory_space<vmem>>, %arg5: memref<128x32xf32, #tpu.memory_space<vmem>>, %arg6: memref<128x8xf32, #tpu.memory_space<vmem>>, %arg7: memref<8x128xf32, #tpu.memory_space<vmem>>, %arg8: memref<1x16x32xf32, #tpu.memory_space<vmem>>) attributes {dimension_semantics = [#tpu.dimension_semantics<parallel>], iteration_bounds = array<i64: 2>, scalar_prefetch = 0 : i64, scratch_operands = 0 : i64, tpu.core_type = #tpu.core_type<tc>, window_params = [{transform_indices = @transform_0, window_bounds = array<i64: 1, 1>}, {transform_indices = @transform_1, window_bounds = array<i64: 1, 16, 32>}, {pipeline_mode = #tpu.pipeline_mode<synchronous>, transform_indices = @transform_2, window_bounds = array<i64: 32, 96>}, {pipeline_mode = #tpu.pipeline_mode<synchronous>, transform_indices = @transform_3, window_bounds = array<i64: 1, 96>}, {pipeline_mode = #tpu.pipeline_mode<synchronous>, transform_indices = @transform_4, window_bounds = array<i64: 128, 32>}, {pipeline_mode = #tpu.pipeline_mode<synchronous>, transform_indices = @transform_5, window_bounds = array<i64: 128, 8>}, {pipeline_mode = #tpu.pipeline_mode<synchronous>, transform_indices = @transform_6, window_bounds = array<i64: 8, 128>}, {transform_indices = @transform_7, window_bounds = array<i64: 1, 16, 32>}]} {
    %c0 = arith.constant 0 : index
    %c0_0 = arith.constant 0 : index
    %c0_1 = arith.constant 0 : index
    %0 = vector.load %arg2[%c0, %c0_0, %c0_1] : memref<1x16x32xf32, #tpu.memory_space<vmem>>, vector<1x16x32xf32>
    %1 = vector.shape_cast %0 : vector<1x16x32xf32> to vector<16x32xf32>
    %c0_2 = arith.constant 0 : index
    %c0_3 = arith.constant 0 : index
    %2 = vector.load %arg5[%c0_2, %c0_3] : memref<128x32xf32, #tpu.memory_space<vmem>>, vector<128x32xf32>
    %c0_4 = arith.constant 0 : index
    %c0_5 = arith.constant 0 : index
    %3 = vector.load %arg6[%c0_4, %c0_5] : memref<128x8xf32, #tpu.memory_space<vmem>>, vector<128x8xf32>
    %c0_6 = arith.constant 0 : index
    %c0_7 = arith.constant 0 : index
    %4 = vector.load %arg7[%c0_6, %c0_7] : memref<8x128xf32, #tpu.memory_space<vmem>>, vector<8x128xf32>
    %c0_8 = arith.constant 0 : index
    %c0_9 = arith.constant 0 : index
    %5 = vector.load %arg3[%c0_8, %c0_9] : memref<32x96xf32, #tpu.memory_space<vmem>>, vector<32x96xf32>
    %cst = arith.constant dense<0.000000e+00> : vector<16x96xf32>
    %6 = tpu.matmul %1, %5, %cst {dimension_numbers = #tpu.dot_dimension_numbers<[1], [0], [0], [1], [0, 0, 1, 1], [], []>} : vector<16x32xf32>, vector<32x96xf32>, vector<16x96xf32> -> vector<16x96xf32>
    %c0_10 = arith.constant 0 : index
    %c0_11 = arith.constant 0 : index
    %7 = vector.load %arg4[%c0_10, %c0_11] : memref<1x96xf32, #tpu.memory_space<vmem>>, vector<1x96xf32>
    %8 = vector.broadcast %7 : vector<1x96xf32> to vector<16x96xf32>
    %9 = arith.addf %6, %8 : vector<16x96xf32>
    %10 = vector.extract_strided_slice %9 {offsets = [0, 0], sizes = [16, 32], strides = [1, 1]} : vector<16x96xf32> to vector<16x32xf32>
    %11 = vector.extract_strided_slice %9 {offsets = [0, 32], sizes = [16, 32], strides = [1, 1]} : vector<16x96xf32> to vector<16x32xf32>
    %12 = vector.extract_strided_slice %9 {offsets = [0, 64], sizes = [16, 32], strides = [1, 1]} : vector<16x96xf32> to vector<16x32xf32>
    %13 = tpu.concatenate %11, %11, %11, %11, %11, %11, %11, %11 in 0 : vector<16x32xf32>, vector<16x32xf32>, vector<16x32xf32>, vector<16x32xf32>, vector<16x32xf32>, vector<16x32xf32>, vector<16x32xf32>, vector<16x32xf32> -> vector<128x32xf32>
    %14 = arith.mulf %13, %2 : vector<128x32xf32>
    %15 = tpu.concatenate %12, %12, %12, %12, %12, %12, %12, %12 in 0 : vector<16x32xf32>, vector<16x32xf32>, vector<16x32xf32>, vector<16x32xf32>, vector<16x32xf32>, vector<16x32xf32>, vector<16x32xf32>, vector<16x32xf32> -> vector<128x32xf32>
    %16 = arith.mulf %15, %2 : vector<128x32xf32>
    %cst_12 = arith.constant dense<0.000000e+00> : vector<16x128xf32>
    %17 = tpu.matmul %10, %14, %cst_12 {dimension_numbers = #tpu.dot_dimension_numbers<[1], [1], [0], [0], [0, 0, 1, 0], [], []>} : vector<16x32xf32>, vector<128x32xf32>, vector<16x128xf32> -> vector<16x128xf32>
    %18 = vector.extract_strided_slice %17 {offsets = [0, 0], sizes = [16, 16], strides = [1, 1]} : vector<16x128xf32> to vector<16x16xf32>
    %cst_13 = arith.constant dense<0xFF800000> : vector<16xf32>
    %19 = vector.multi_reduction <maximumf>, %18, %cst_13 [1] : vector<16x16xf32> to vector<16xf32>
    %20 = vector.shape_cast %19 : vector<16xf32> to vector<16x1xf32>
    %21 = vector.extract_strided_slice %17 {offsets = [0, 16], sizes = [16, 16], strides = [1, 1]} : vector<16x128xf32> to vector<16x16xf32>
    %cst_14 = arith.constant dense<0xFF800000> : vector<16xf32>
    %22 = vector.multi_reduction <maximumf>, %21, %cst_14 [1] : vector<16x16xf32> to vector<16xf32>
    %23 = vector.shape_cast %22 : vector<16xf32> to vector<16x1xf32>
    %24 = vector.extract_strided_slice %17 {offsets = [0, 32], sizes = [16, 16], strides = [1, 1]} : vector<16x128xf32> to vector<16x16xf32>
    %cst_15 = arith.constant dense<0xFF800000> : vector<16xf32>
    %25 = vector.multi_reduction <maximumf>, %24, %cst_15 [1] : vector<16x16xf32> to vector<16xf32>
    %26 = vector.shape_cast %25 : vector<16xf32> to vector<16x1xf32>
    %27 = vector.extract_strided_slice %17 {offsets = [0, 48], sizes = [16, 16], strides = [1, 1]} : vector<16x128xf32> to vector<16x16xf32>
    %cst_16 = arith.constant dense<0xFF800000> : vector<16xf32>
    %28 = vector.multi_reduction <maximumf>, %27, %cst_16 [1] : vector<16x16xf32> to vector<16xf32>
    %29 = vector.shape_cast %28 : vector<16xf32> to vector<16x1xf32>
    %30 = vector.extract_strided_slice %17 {offsets = [0, 64], sizes = [16, 16], strides = [1, 1]} : vector<16x128xf32> to vector<16x16xf32>
    %cst_17 = arith.constant dense<0xFF800000> : vector<16xf32>
    %31 = vector.multi_reduction <maximumf>, %30, %cst_17 [1] : vector<16x16xf32> to vector<16xf32>
    %32 = vector.shape_cast %31 : vector<16xf32> to vector<16x1xf32>
    %33 = vector.extract_strided_slice %17 {offsets = [0, 80], sizes = [16, 16], strides = [1, 1]} : vector<16x128xf32> to vector<16x16xf32>
    %cst_18 = arith.constant dense<0xFF800000> : vector<16xf32>
    %34 = vector.multi_reduction <maximumf>, %33, %cst_18 [1] : vector<16x16xf32> to vector<16xf32>
    %35 = vector.shape_cast %34 : vector<16xf32> to vector<16x1xf32>
    %36 = vector.extract_strided_slice %17 {offsets = [0, 96], sizes = [16, 16], strides = [1, 1]} : vector<16x128xf32> to vector<16x16xf32>
    %cst_19 = arith.constant dense<0xFF800000> : vector<16xf32>
    %37 = vector.multi_reduction <maximumf>, %36, %cst_19 [1] : vector<16x16xf32> to vector<16xf32>
    %38 = vector.shape_cast %37 : vector<16xf32> to vector<16x1xf32>
    %39 = vector.extract_strided_slice %17 {offsets = [0, 112], sizes = [16, 16], strides = [1, 1]} : vector<16x128xf32> to vector<16x16xf32>
    %cst_20 = arith.constant dense<0xFF800000> : vector<16xf32>
    %40 = vector.multi_reduction <maximumf>, %39, %cst_20 [1] : vector<16x16xf32> to vector<16xf32>
    %41 = vector.shape_cast %40 : vector<16xf32> to vector<16x1xf32>
    %42 = tpu.concatenate %20, %23, %26, %29, %32, %35, %38, %41 in 1 : vector<16x1xf32>, vector<16x1xf32>, vector<16x1xf32>, vector<16x1xf32>, vector<16x1xf32>, vector<16x1xf32>, vector<16x1xf32>, vector<16x1xf32> -> vector<16x8xf32>
    %cst_21 = arith.constant dense<0.000000e+00> : vector<16x128xf32>
    %43 = tpu.matmul %42, %4, %cst_21 {dimension_numbers = #tpu.dot_dimension_numbers<[1], [0], [0], [1], [0, 0, 1, 1], [], []>} : vector<16x8xf32>, vector<8x128xf32>, vector<16x128xf32> -> vector<16x128xf32>
    %44 = arith.subf %17, %43 : vector<16x128xf32>
    %45 = math.exp %44 : vector<16x128xf32>
    %cst_22 = arith.constant dense<0.000000e+00> : vector<16x8xf32>
    %46 = tpu.matmul %45, %3, %cst_22 {dimension_numbers = #tpu.dot_dimension_numbers<[1], [0], [0], [1], [0, 0, 1, 1], [], []>} : vector<16x128xf32>, vector<128x8xf32>, vector<16x8xf32> -> vector<16x8xf32>
    %cst_23 = arith.constant dense<0.000000e+00> : vector<16x128xf32>
    %47 = tpu.matmul %46, %4, %cst_23 {dimension_numbers = #tpu.dot_dimension_numbers<[1], [0], [0], [1], [0, 0, 1, 1], [], []>} : vector<16x8xf32>, vector<8x128xf32>, vector<16x128xf32> -> vector<16x128xf32>
    %48 = arith.divf %45, %47 : vector<16x128xf32>
    %cst_24 = arith.constant dense<0.000000e+00> : vector<16x32xf32>
    %49 = tpu.matmul %48, %16, %cst_24 {dimension_numbers = #tpu.dot_dimension_numbers<[1], [0], [0], [1], [0, 0, 1, 1], [], []>} : vector<16x128xf32>, vector<128x32xf32>, vector<16x32xf32> -> vector<16x32xf32>
    %c0_25 = arith.constant 0 : index
    %c0_26 = arith.constant 0 : index
    %50 = memref.load %arg1[%c0_25, %c0_26] : memref<1x1xf32, #tpu.memory_space<smem>>
    %51 = vector.broadcast %50 : f32 to vector<16x32xf32>
    %52 = arith.mulf %51, %49 : vector<16x32xf32>
    %53 = arith.addf %52, %1 : vector<16x32xf32>
    %c0_27 = arith.constant 0 : index
    %c0_28 = arith.constant 0 : index
    %c0_29 = arith.constant 0 : index
    %54 = vector.load %arg8[%c0_27, %c0_28, %c0_29] : memref<1x16x32xf32, #tpu.memory_space<vmem>>, vector<1x16x32xf32>
    %55 = vector.shape_cast %54 : vector<1x16x32xf32> to vector<16x32xf32>
    %56 = vector.shape_cast %53 : vector<16x32xf32> to vector<1x16x32xf32>
    tpu.vector_store %arg8[%c0_27, %c0_28, %c0_29], %56 {strides = array<i32>} : memref<1x16x32xf32, #tpu.memory_space<vmem>>, vector<1x16x32xf32>,
    return
  }
  func.func @transform_0(%arg0: i32) -> (i32, i32) {
    %c0_i32 = arith.constant 0 : i32
    %c0_i32_0 = arith.constant 0 : i32
    %c0_i32_1 = arith.constant 0 : i32
    return %c0_i32, %c0_i32_0 : i32, i32
  }
  func.func @transform_1(%arg0: i32) -> (i32, i32, i32) {
    %c0_i32 = arith.constant 0 : i32
    %c0_i32_0 = arith.constant 0 : i32
    %c0_i32_1 = arith.constant 0 : i32
    return %arg0, %c0_i32, %c0_i32_0 : i32, i32, i32
  }
  func.func @transform_2(%arg0: i32) -> (i32, i32) {
    %c0_i32 = arith.constant 0 : i32
    %c0_i32_0 = arith.constant 0 : i32
    %c0_i32_1 = arith.constant 0 : i32
    return %c0_i32, %c0_i32_0 : i32, i32
  }
  func.func @transform_3(%arg0: i32) -> (i32, i32) {
    %c0_i32 = arith.constant 0 : i32
    %c0_i32_0 = arith.constant 0 : i32
    %c0_i32_1 = arith.constant 0 : i32
    return %c0_i32, %c0_i32_0 : i32, i32
  }
  func.func @transform_4(%arg0: i32) -> (i32, i32) {
    %c0_i32 = arith.constant 0 : i32
    %c0_i32_0 = arith.constant 0 : i32
    %c0_i32_1 = arith.constant 0 : i32
    return %c0_i32, %c0_i32_0 : i32, i32
  }
  func.func @transform_5(%arg0: i32) -> (i32, i32) {
    %c0_i32 = arith.constant 0 : i32
    %c0_i32_0 = arith.constant 0 : i32
    %c0_i32_1 = arith.constant 0 : i32
    return %c0_i32, %c0_i32_0 : i32, i32
  }
  func.func @transform_6(%arg0: i32) -> (i32, i32) {
    %c0_i32 = arith.constant 0 : i32
    %c0_i32_0 = arith.constant 0 : i32
    %c0_i32_1 = arith.constant 0 : i32
    return %c0_i32, %c0_i32_0 : i32, i32
  }
  func.func @transform_7(%arg0: i32) -> (i32, i32, i32) {
    %c0_i32 = arith.constant 0 : i32
    %c0_i32_0 = arith.constant 0 : i32
    %c0_i32_1 = arith.constant 0 : i32
    return %arg0, %c0_i32, %c0_i32_0 : i32, i32, i32
  }
}

</mosaic_0001>

<bundles_post_ra>
// kernel: tpu_custom_call.1
= control target key start
LH: loop header
LB: loop body
LE: loop exit
PB: predicated region body
PF: predicated region fallthrough
CT: control target
= control target key end

     0   :  { %s2300_s0 = inlined_call_operand.<no memory space> [shape: f32[1,1], index: 0, kind: input, shape index: {}]   ;;  %s2301_s1 = inlined_call_operand.vmem [shape: f32[2,16,32], index: 1, kind: input, shape index: {}]   ;;  %s2302_s2 = inlined_call_operand.vmem [shape: f32[32,96], index: 2, kind: input, shape index: {}]   ;;  %s2303_s3 = inlined_call_operand.vmem [shape: f32[1,96], index: 3, kind: input, shape index: {}]   ;;  %s2304_s4 = inlined_call_operand.vmem [shape: f32[128,32], index: 4, kind: input, shape index: {}]   ;;  %s2305_s5 = inlined_call_operand.vmem [shape: f32[128,8], index: 5, kind: input, shape index: {}]   ;;  %s2306_s6 = inlined_call_operand.vmem [shape: f32[8,128], index: 6, kind: input, shape index: {}]   ;;  %s2307_s7 = inlined_call_operand.hbm [shape: f32[2,16,32], index: 7, kind: output, shape index: {}]  }
   0x1   :  { %12 = sst [smem:[#allocation2]] %s2300_s0 }
   0x2   :  { %13 = vsyncpa [#allocation4], 0 }
   0x3   :  { %15 = vsyncpa [#allocation4 + $0x1], 0  ;;  %s1855_s26 = smov 0   ;;  %s1857_s27 = smov 0  }
   0x4   :  { %s1859_s28 = smov 0   ;;  %s1861_s29 = smov 0  }
   0x5 LB: > { %s1876_s0 = sadd.s32 4294967295, %s1804_s29   ;;  %s1259_s30 = sadd.s32 4294967294, %s1804_s29   ;;  %s1804_s29 = sphi %s1861_s29, %s2315_s29   ;;  %s1800_s28 = sphi %s1859_s28, %s2314_s28   ;;  %s1796_s27 = sphi %s1857_s27, %s2313_s27   ;;  %s1792_s26 = sphi %s1855_s26, %s2312_s26  }
   0x6   : > { %s1880_s8 = sadd.s32 1, %s1804_s29   ;;  %s180_s9 = sadd.s32 1, %s1800_s28 }
   0x7   : > { %s177_s10 = ssub.s32 %s1804_s29, %s1880_s8  ;;  %p190_p0 = scmp.ne.s32.totalorder %s1800_s28, %s1796_s27 }
   0x8   : > { %p178_p1 = scmp.eq.s32.totalorder %s177_s10, 0  ;;  %p191_p2 = scmp.eq.s32.totalorder %s1876_s0, 1 }
   0x9   : > { %p196_p3 = scmp.ne.s32.totalorder %s1796_s27, %s1792_s26  ;;  %p197_p4 = scmp.eq.s32.totalorder %s1259_s30, 1 }
   0xa   : > { %s1891_s11 = scalar_select %p178_p1, %s1800_s28, %s180_s9  }
   0xb   : > { %p1893_p5 = por %p191_p2, %p190_p0  ;;  %p1897_p6 = por %p197_p4, %p196_p3 }
   0xc   : > { %p1262_p7 = scmp.ge.s32.totalorder %s1804_s29, 1  ;;  %p241_p8 = scmp.lt.s32.totalorder %s1804_s29, 3 }
   0xe   : > { %p242_p9 = pnand %p1262_p7, %p241_p8 }
   0xf   : > { %v313_v0 = vld [vmem:[%s2302_s2] sm:$0xff] (!%p242_p9)  ;;  %v314_v1 = vld [vmem:[%s2302_s2 + $0x8] sm:$0xff] (!%p242_p9)  ;;  %v315_v2 = vld [vmem:[%s2302_s2 + $0x10] sm:$0xff] (!%p242_p9)  ;;  %p273_p10 = scmp.lt.s32.totalorder (!%p242_p9), %s1876_s0, 1  ;;  %s1806_s25 = smov (!%p242_p9), 32   ;;  %vm324_vm0 = vcmask (!%p242_p9), 261120  }
  0x10   : > { %245 = sbr.rel (%p242_p9) target bundleno = 1721 (0x6b9), region = 48  ;;  %v1490_v3 = vpack.c.bf16 (!%p242_p9), %v314_v1, %v313_v0  ;;  %v316_v4 = vld [vmem:[%s2302_s2 + $0x18] sm:$0xff] (!%p242_p9)  ;;  %v1919_v5 = vld [vmem:[%s2304_s4 + $0x10] sm:$0xff] (!%p242_p9)  ;;  %v1927_v7 = vld [vmem:[%s2304_s4] sm:$0xff] (!%p242_p9)  ;;  %vm711_vm2 = vcmask (!%p242_p9), 130048   ;;  %vm718_vm3 = vcmask (!%p242_p9), 261248  }
  0x11   : > { %v1494_v6 = vpack.c.bf16 (!%p242_p9), %v316_v4, %v315_v2  ;;  %426 = vrot.lane.b32.xlu1 (!%p242_p9), %v1919_v5, %s1806_s25  ;;  %422 = vrot.lane.b32.xlu0 (!%p242_p9), %v1927_v7, %s1806_s25  ;;  %v1934_v8 = vld [vmem:[%s2304_s4 + $0x18] sm:$0xff] (!%p242_p9)  ;;  %v1939_v9 = vld [vmem:[%s2304_s4 + $0x8] sm:$0xff] (!%p242_p9)  ;;  %vm2067_vm1 = vmpackc.low (!%p242_p9), %vm324_vm0, %vm324_vm0  ;;  %vm725_vm4 = vcmask (!%p242_p9), 392448   ;;  %vm732_vm5 = vcmask (!%p242_p9), 523648   ;;  %vm739_vm6 = vcmask (!%p242_p9), 654848   ;;  %s1808_s19 = smov (!%p242_p9), 64  }
  0x12   : > { %1491 = vmatprep.subr.bf16.mxu1 (!%p242_p9), %v1490_v3  ;;  %v1955_v11 = vld [vmem:[%s2304_s4 + $0x28] sm:$0xff] (!%p242_p9)  ;;  %v1962_v13 = vld [vmem:[%s2304_s4 + $0x20] sm:$0xff] (!%p242_p9)  ;;  %v1973_v14 = vld [vmem:[%s2304_s4 + $0x38] sm:$0xff] (!%p242_p9)  ;;  %vm746_vm7 = vcmask (!%p242_p9), 786048   ;;  %vm753_vm8 = vcmask (!%p242_p9), 917248   ;;  %vm760_vm9 = vcmask (!%p242_p9), 1048448  }
  0x13   : > { %1493 = vmatpush3.bf16.msra.mxu1 (!%p242_p9), %v1490_v3  ;;  %v1978_v15 = vld [vmem:[%s2304_s4 + $0x30] sm:$0xff] (!%p242_p9)  ;;  %v1987_v16 = vld [vmem:[%s2304_s4 + $0x48] sm:$0xff] (!%p242_p9)  ;;  %v1992_v17 = vld [vmem:[%s2304_s4 + $0x40] sm:$0xff] (!%p242_p9)  ;;  %vm767_vm10 = vcmask (!%p242_p9), 7168   ;;  %vm770_vm11 = vcmask (!%p242_p9), 15360   ;;  %vm773_vm12 = vcmask (!%p242_p9), 23552  }
  0x14   : > { %1495 = vmatprep.subr.bf16.mxu1 (!%p242_p9), %v1494_v6  ;;  %v2001_v18 = vld [vmem:[%s2304_s4 + $0x58] sm:$0xff] (!%p242_p9)  ;;  %v2006_v19 = vld [vmem:[%s2304_s4 + $0x50] sm:$0xff] (!%p242_p9)  ;;  %v2015_v20 = vld [vmem:[%s2304_s4 + $0x68] sm:$0xff] (!%p242_p9)  ;;  %vm776_vm13 = vcmask (!%p242_p9), 31744   ;;  %vm782_vm14 = vcmask (!%p242_p9), 48128   ;;  %vm779_vm15 = vcmask (!%p242_p9), 39936  }
  0x15   : > { %428 = vrot.lane.b32.xlu1 (!%p242_p9), %v1934_v8, %s1806_s25  ;;  %424 = vrot.lane.b32.xlu0 (!%p242_p9), %v1939_v9, %s1806_s25  ;;  %v2020_v21 = vld [vmem:[%s2304_s4 + $0x60] sm:$0xff] (!%p242_p9)  ;;  %v2029_v22 = vld [vmem:[%s2304_s4 + $0x78] sm:$0xff] (!%p242_p9)  ;;  %s1175_s30 = sld [smem:[#allocation2]] (!%p242_p9)  ;;  %s270_s9 = sand.u32 (!%p242_p9), 1, %s1796_s27  }
  0x16   : > { %v2034_v23 = vld [vmem:[%s2304_s4 + $0x70] sm:$0xff] (!%p242_p9)  ;;  %v1266_v36 = vld [vmem:[%s2303_s3] ss:$0 sm:$0xff] (!%p242_p9)  ;;  %s1263_s10 = sshll.u32 (!%p242_p9), %s270_s9, 4  ;;  %s1297_s16 = sshll.u32 (!%p242_p9), %s1876_s0, 8 }
  0x17   : > { %s274_s24 = scalar_select %p273_p10, %s1876_s0, 1  ;;  %1497 = vmatpush3.bf16.msra.mxu1 %v1494_v6 }
  0x18   : > { %s272_s14 = scalar_lea.vmem [#allocation3], %s1263_s10  ;;  %s2252_s18 = scalar_lea.hbm %s2307_s7, %s1297_s16 }
  0x19   : > { %s1296_s15 = sshll.u32 %s274_s24, 4  ;;  %432 = vrot.lane.b32.xlu1 %v1955_v11, %s1806_s25  ;;  %430 = vrot.lane.b32.xlu0 %v1962_v13, %s1806_s25  ;;  %s2259_s0 = scalar_lea.sflag [#allocation4], %s270_s9 }
  0x1a   : > { %s277_s20 = scalar_lea.vmem %s2301_s1, %s1296_s15  ;;  %s1197_s15 = sshll.u32 %s272_s14, 4  ;;  %s2254_s15 = int_to_ptr.vmem [resolvable:$true] %s1197_s15 }
  0x1b   : > { %v1944_v10 = vld [vmem:[%s277_s20] sm:$0xff]  ;;  %v1957_v12 = vld [vmem:[%s277_s20 + $0x8] sm:$0xff]  ;;  %s1809_s20 = smov [#allocation3]  }
  0x1c   : > { %1372 = vmatprep.mubr.msk.f32.mxu1 %vm324_vm0, %v1944_v10  ;;  %s1746_s21 = sshll.u32 %s1809_s20, 4  ;;  %s1747_s21 = int_to_ptr.vmem [resolvable:$false] %s1746_s21 }
  0x1d   : > { %1373 = vmatmul.mubr.msk.f32.vlgmr.msra.gmra.mrb[0].mxu1 %vm324_vm0, %v1957_v12  ;;  %436 = vrot.lane.b32.xlu1 %v1973_v14, %s1806_s25  ;;  %s1748_s22 = scalar_lea.vmem %s1747_s21, 512  ;;  %p1749_p0 = scmp.lt.s32.totalorder %s2254_s15, %s1747_s21 }
  0x1e   : > { %434 = vrot.lane.b32.xlu0 %v1978_v15, %s1806_s25 }
  0x21   : > { %440 = vrot.lane.b32.xlu1 %v1987_v16, %s1806_s25 }
  0x22   : > { %438 = vrot.lane.b32.xlu0 %v1992_v17, %s1806_s25 }
  0x25   : > { %444 = vrot.lane.b32.xlu1 %v2001_v18, %s1806_s25 }
  0x26   : > { %442 = vrot.lane.b32.xlu0 %v2006_v19, %s1806_s25 }
  0x29   : > { %448 = vrot.lane.b32.xlu1 %v2015_v20, %s1806_s25 }
  0x2a   : > { %446 = vrot.lane.b32.xlu0 %v2020_v21, %s1806_s25 }
  0x2d   : > { %452 = vrot.lane.b32.xlu1 %v2029_v22, %s1806_s25 }
  0x2e   : > { %450 = vrot.lane.b32.xlu0 %v2034_v23, %s1806_s25  ;;  %s1807_s25 = smov 96  }
  0x83   : > { %v427_v24 = vpop.permute.xlu1 %426  ;;  %v423_v25 = vpop.permute.xlu0 %422 }
  0x87   : > { %v429_v26 = vpop.permute.xlu1 %428  ;;  %v425_v27 = vpop.permute.xlu0 %424 }
  0x8b   : > { %v433_v28 = vpop.permute.xlu1 %432  ;;  %v431_v29 = vpop.permute.xlu0 %430 }
  0x8f   : > { %v437_v30 = vpop.permute.xlu1 %436 }
  0x90   : > { %v435_v31 = vpop.permute.xlu0 %434 }
  0x93   : > { %v441_v32 = vpop.permute.xlu1 %440 }
  0x94   : > { %v439_v33 = vpop.permute.xlu0 %438 }
  0x97   : > { %v445_v34 = vpop.permute.xlu1 %444 }
  0x98   : > { %v443_v35 = vpop.permute.xlu0 %442 }
  0x9b   : > { %v449_v43 = vpop.permute.xlu1 %448 }
  0x9c   : > { %v447_v44 = vpop.permute.xlu0 %446 }
  0x9f   : > { %v453_v55 = vpop.permute.xlu1 %452 }
  0xa0   : > { %v451_v56 = vpop.permute.xlu0 %450 }
  0xf0   : > { %v1374_v37 = vpop.f32.mrb[0].mxu1 }
  0xf1   : > { %v2043_v38 = vadd.f32 %v1374_v37, %v1266_v36  ;;  %v397_v39 = vpop.f32.mrb[1].mxu1 }
  0xf2   : > { %v2045_v40 = vadd.f32 %v1266_v36, %v397_v39 }
  0xf3   : > { %v473_v41 = vmul.f32 %v429_v26, %v2043_v38  ;;  %v471_v42 = vmul.f32 %v425_v27, %v2043_v38  ;;  %v477_v48 = vmul.f32 %v437_v30, %v2043_v38  ;;  %v475_v52 = vmul.f32 %v433_v28, %v2043_v38 }
  0xf4   : > { %1407 = vmatprep.mubr.msk.f32.mxu1 %vm324_vm0, %v2045_v40  ;;  %v472_v45 = vmul.f32 %v427_v24, %v2045_v40  ;;  %v470_v46 = vmul.f32 %v423_v25, %v2045_v40  ;;  %v476_v47 = vmul.f32 %v435_v31, %v2045_v40  ;;  %v474_v51 = vmul.f32 %v431_v29, %v2045_v40 }
  0xf5   : > { %v480_v53 = vmul.f32 %v443_v35, %v2045_v40  ;;  %v481_v54 = vmul.f32 %v445_v34, %v2043_v38  ;;  %v478_v59 = vmul.f32 %v439_v33, %v2045_v40  ;;  %v479_v60 = vmul.f32 %v441_v32, %v2043_v38 }
  0xf6   : > { %v1659_v49 = vpack.i.bf16 %v473_v41, %v472_v45  ;;  %v1654_v50 = vpack.i.bf16 %v471_v42, %v470_v46  ;;  %v1669_v57 = vpack.i.bf16 %v477_v48, %v476_v47  ;;  %v1664_v58 = vpack.i.bf16 %v475_v52, %v474_v51 }
  0xf7   : > { %v485_v61 = vmul.f32 %v453_v55, %v2043_v38  ;;  %v484_v62 = vmul.f32 %v451_v56, %v2045_v40  ;;  %v1679_v63 = vpack.i.bf16 %v481_v54, %v480_v53  ;;  %v1674_v0 = vpack.i.bf16 %v479_v60, %v478_v59 }
  0xf8   : > { %1660 = vrot.lane.b32.xlu1 %v1659_v49, %s1807_s25  ;;  %1655 = vrot.lane.b32.xlu0 %v1654_v50, %s1807_s25  ;;  %v482_v1 = vmul.f32 %v447_v44, %v2045_v40  ;;  %v483_v2 = vmul.f32 %v449_v43, %v2043_v38 }
  0xf9   : > { %v1689_v3 = vpack.i.bf16 %v485_v61, %v484_v62 }
  0xfa   : > { %v1684_v4 = vpack.i.bf16 %v483_v2, %v482_v1 }
  0xfc   : > { %1670 = vrot.lane.b32.xlu1 %v1669_v57, %s1807_s25  ;;  %1665 = vrot.lane.b32.xlu0 %v1664_v58, %s1807_s25 }
 0x100   : > { %1680 = vrot.lane.b32.xlu1 %v1679_v63, %s1807_s25  ;;  %1675 = vrot.lane.b32.xlu0 %v1674_v0, %s1807_s25 }
 0x104   : > { %1690 = vrot.lane.b32.xlu1 %v1689_v3, %s1807_s25  ;;  %1685 = vrot.lane.b32.xlu0 %v1684_v4, %s1807_s25  ;;  %s1742_s25 = scalar_lea.vmem %s2254_s15, 256 }
 0x105   : > { %p1743_p11 = scmp.ne.s32.totalorder %s2254_s15, %s1742_s25  ;;  %p1750_p1 = scmp.lt.s32.totalorder %s1748_s22, %s1742_s25 }
 0x107   : > { %p1744_p12 = pnand %p1743_p11, %p1893_p5  ;;  %p1751_p2 = por %p1750_p1, %p1749_p0 }
 0x109   : > { %p1745_p13 = pneg %p1744_p12 }
 0x10b   : > { %p1752_p3 = pnand %p1751_p2, %p1745_p13 }
 0x16a   : > { %v1661_v6 = vpop.permute.xlu1 %1660  ;;  %v1656_v24 = vpop.permute.xlu0 %1655 }
 0x16b   : > { %v1663_v25 = vunpack.i.h.bf16 %v1661_v6  ;;  %v1662_v26 = vunpack.i.l.bf16 %v1661_v6  ;;  %v1658_v27 = vunpack.i.h.bf16 %v1656_v24  ;;  %v1657_v28 = vunpack.i.l.bf16 %v1656_v24 }
 0x16d   : > { %v1498_v30 = vpack.c.bf16 %v1658_v27, %v1657_v28  ;;  %v1504_v31 = vpack.c.bf16 %v1663_v25, %v1662_v26 }
 0x16e   : > { %v1666_v32 = vpop.permute.xlu0 %1665  ;;  %v1671_v36 = vpop.permute.xlu1 %1670 }
 0x16f   : > { %1500 = vmatprep.subr.msk.bf16.mxu1 %vm2067_vm1, %v1498_v30  ;;  %v1668_v33 = vunpack.i.h.bf16 %v1666_v32  ;;  %v1667_v34 = vunpack.i.l.bf16 %v1666_v32  ;;  %v1673_v37 = vunpack.i.h.bf16 %v1671_v36  ;;  %v1672_v39 = vunpack.i.l.bf16 %v1671_v36 }
 0x170   : > { %1503 = vmatpush3.bf16.xpose.msk.msra.mxu1 %vm2067_vm1, %v1498_v30  ;;  %v2132_v30 = vld [vmem:[%s2306_s6] sm:$0xff] }
 0x171   : > { %1506 = vmatprep.subr.msk.bf16.mxu1 %vm2067_vm1, %v1504_v31  ;;  %v1510_v35 = vpack.c.bf16 %v1668_v33, %v1667_v34  ;;  %v1516_v41 = vpack.c.bf16 %v1673_v37, %v1672_v39  ;;  %1410 = vmatprep.subr.mxu0 %v2132_v30 }
 0x172   : > { %v1676_v42 = vpop.permute.xlu0 %1675  ;;  %v1681_v46 = vpop.permute.xlu1 %1680  ;;  %1411 = vmatpush3.msra.mxu0 %v2132_v30 }
 0x173   : > { %v1678_v43 = vunpack.i.h.bf16 %v1676_v42  ;;  %v1677_v44 = vunpack.i.l.bf16 %v1676_v42  ;;  %v1683_v47 = vunpack.i.h.bf16 %v1681_v46  ;;  %v1682_v48 = vunpack.i.l.bf16 %v1681_v46 }
 0x175   : > { %v1522_v45 = vpack.c.bf16 %v1678_v43, %v1677_v44  ;;  %v1528_v49 = vpack.c.bf16 %v1683_v47, %v1682_v48 }
 0x176   : > { %v1686_v50 = vpop.permute.xlu0 %1685  ;;  %v1691_v54 = vpop.permute.xlu1 %1690 }
 0x177   : > { %v1688_v51 = vunpack.i.h.bf16 %v1686_v50  ;;  %v1687_v52 = vunpack.i.l.bf16 %v1686_v50  ;;  %v1693_v55 = vunpack.i.h.bf16 %v1691_v54  ;;  %v1692_v56 = vunpack.i.l.bf16 %v1691_v54 }
 0x178   : > { %1509 = vmatpush3.bf16.xpose.msk.msra.mxu1 %vm2067_vm1, %v1504_v31 }
 0x179   : > { %1512 = vmatprep.subr.msk.bf16.mxu1 %vm2067_vm1, %v1510_v35  ;;  %v1534_v53 = vpack.c.bf16 %v1688_v51, %v1687_v52  ;;  %v1540_v57 = vpack.c.bf16 %v1693_v55, %v1692_v56 }
 0x180   : > { %1515 = vmatpush3.bf16.xpose.msk.msra.mxu1 %vm2067_vm1, %v1510_v35 }
 0x181   : > { %1518 = vmatprep.subr.msk.bf16.mxu1 %vm2067_vm1, %v1516_v41 }
 0x188   : > { %1521 = vmatpush3.bf16.xpose.msk.msra.mxu1 %vm2067_vm1, %v1516_v41 }
 0x189   : > { %1524 = vmatprep.subr.msk.bf16.mxu1 %vm2067_vm1, %v1522_v45 }
 0x190   : > { %1527 = vmatpush3.bf16.xpose.msk.msra.mxu1 %vm2067_vm1, %v1522_v45 }
 0x191   : > { %1530 = vmatprep.subr.msk.bf16.mxu1 %vm2067_vm1, %v1528_v49 }
 0x198   : > { %1533 = vmatpush3.bf16.xpose.msk.msra.mxu1 %vm2067_vm1, %v1528_v49 }
 0x199   : > { %1536 = vmatprep.subr.msk.bf16.mxu1 %vm2067_vm1, %v1534_v53 }
 0x1a0   : > { %1539 = vmatpush3.bf16.xpose.msk.msra.mxu1 %vm2067_vm1, %v1534_v53 }
 0x1a1   : > { %1542 = vmatprep.subr.msk.bf16.mxu1 %vm2067_vm1, %v1540_v57 }
 0x1a8   : > { %1545 = vmatpush3.bf16.xpose.msk.msra.mxu1 %vm2067_vm1, %v1540_v57  ;;  %vm785_vm1 = vcmask 56320  }
 0x1af   : > { %1408 = vmatmul.mubr.msk.f32.vlgmr.msra.gmra.mrb[2].mxu1 %vm324_vm0, %v2043_v38 }
 0x282   : > { %v2105_v58 = vpop.f32.mrb[2].mxu1 }
 0x283   : > { %v2107_v59 = vpop.f32.mrb[3].mxu1  ;;  %v715_v60 = vsel %vm711_vm2, %v2105_v58, -inf  ;;  %v722_v62 = vsel %vm718_vm3, %v2105_v58, -inf  ;;  %v729_v0 = vsel %vm725_vm4, %v2105_v58, -inf  ;;  %v736_v2 = vsel %vm732_vm5, %v2105_v58, -inf }
 0x284   : > { %716 = vmax.xlane.f32.xlu0 %v715_v60  ;;  %v719_v61 = vsel %vm718_vm3, %v2107_v59, -inf  ;;  %v726_v63 = vsel %vm725_vm4, %v2107_v59, -inf  ;;  %v733_v1 = vsel %vm732_vm5, %v2107_v59, -inf  ;;  %v740_v3 = vsel %vm739_vm6, %v2107_v59, -inf }
 0x285   : > { %720 = vmax.xlane.f32.xlu1 %v719_v61  ;;  %v743_v4 = vsel %vm739_vm6, %v2105_v58, -inf  ;;  %v747_v6 = vsel %vm746_vm7, %v2107_v59, -inf  ;;  %v750_v24 = vsel %vm746_vm7, %v2105_v58, -inf  ;;  %v754_v25 = vsel %vm753_vm8, %v2107_v59, -inf }
 0x286   : > { %v712_v26 = vsel %vm711_vm2, %v2107_v59, -inf  ;;  %v761_v27 = vsel %vm760_vm9, %v2107_v59, -inf  ;;  %v757_v28 = vsel %vm753_vm8, %v2105_v58, -inf  ;;  %v764_v29 = vsel %vm760_vm9, %v2105_v58, -inf }
 0x287   : > { %vm788_vm2 = vcmask 64512  }
 0x288   : > { %723 = vmax.xlane.f32.xlu0 %v722_v62 }
 0x289   : > { %727 = vmax.xlane.f32.xlu1 %v726_v63 }
 0x28c   : > { %730 = vmax.xlane.f32.xlu0 %v729_v0 }
 0x28d   : > { %734 = vmax.xlane.f32.xlu1 %v733_v1 }
 0x290   : > { %737 = vmax.xlane.f32.xlu0 %v736_v2 }
 0x291   : > { %741 = vmax.xlane.f32.xlu1 %v740_v3 }
 0x294   : > { %744 = vmax.xlane.f32.xlu0 %v743_v4 }
 0x295   : > { %748 = vmax.xlane.f32.xlu1 %v747_v6 }
 0x298   : > { %751 = vmax.xlane.f32.xlu0 %v750_v24 }
 0x299   : > { %755 = vmax.xlane.f32.xlu1 %v754_v25 }
 0x29c   : > { %713 = vmax.xlane.f32.xlu0 %v712_v26 }
 0x29d   : > { %762 = vmax.xlane.f32.xlu1 %v761_v27 }
 0x2a0   : > { %758 = vmax.xlane.f32.xlu0 %v757_v28 }
 0x2a4   : > { %765 = vmax.xlane.f32.xlu0 %v764_v29 }
 0x2ae   : > { %486 = vrot.lane.b32.xlu1 %v1927_v7, %s1808_s19 }
 0x2b2   : > { %490 = vrot.lane.b32.xlu1 %v1919_v5, %s1808_s19 }
 0x2b6   : > { %492 = vrot.lane.b32.xlu1 %v1934_v8, %s1808_s19 }
 0x2ba   : > { %488 = vrot.lane.b32.xlu0 %v1939_v9, %s1808_s19  ;;  %496 = vrot.lane.b32.xlu1 %v1955_v11, %s1808_s19 }
 0x2be   : > { %494 = vrot.lane.b32.xlu0 %v1962_v13, %s1808_s19  ;;  %500 = vrot.lane.b32.xlu1 %v1973_v14, %s1808_s19 }
 0x2c2   : > { %498 = vrot.lane.b32.xlu0 %v1978_v15, %s1808_s19  ;;  %504 = vrot.lane.b32.xlu1 %v1987_v16, %s1808_s19 }
 0x2c6   : > { %502 = vrot.lane.b32.xlu0 %v1992_v17, %s1808_s19  ;;  %508 = vrot.lane.b32.xlu1 %v2001_v18, %s1808_s19 }
 0x2ca   : > { %506 = vrot.lane.b32.xlu0 %v2006_v19, %s1808_s19  ;;  %512 = vrot.lane.b32.xlu1 %v2015_v20, %s1808_s19 }
 0x2ce   : > { %510 = vrot.lane.b32.xlu0 %v2020_v21, %s1808_s19  ;;  %516 = vrot.lane.b32.xlu1 %v2029_v22, %s1808_s19 }
 0x2d2   : > { %514 = vrot.lane.b32.xlu0 %v2034_v23, %s1808_s19 }
 0x311   : > { %v717_v5 = vpop.xlane.xlu0 %716 }
 0x312   : > { %v721_v7 = vpop.xlane.xlu1 %720 }
 0x315   : > { %v724_v8 = vpop.xlane.xlu0 %723 }
 0x316   : > { %v728_v9 = vpop.xlane.xlu1 %727  ;;  %v769_v23 = vsel %vm767_vm10, %v717_v5, %v724_v8  ;;  %v296_v8 = vld [vmem:[%s2305_s5] sm:$0xff] }
 0x319   : > { %v731_v11 = vpop.xlane.xlu0 %730 }
 0x31a   : > { %v735_v13 = vpop.xlane.xlu1 %734  ;;  %v772_v33 = vsel %vm770_vm11, %v769_v23, %v731_v11  ;;  %v298_v11 = vld [vmem:[%s2305_s5 + $0x10] sm:$0xff] }
 0x31d   : > { %v738_v14 = vpop.xlane.xlu0 %737 }
 0x31e   : > { %v742_v15 = vpop.xlane.xlu1 %741  ;;  %v775_v36 = vsel %vm773_vm12, %v772_v33, %v738_v14 }
 0x321   : > { %v745_v16 = vpop.xlane.xlu0 %744 }
 0x322   : > { %v749_v17 = vpop.xlane.xlu1 %748  ;;  %v778_v41 = vsel %vm776_vm13, %v775_v36, %v745_v16  ;;  %v299_v16 = vld [vmem:[%s2305_s5 + $0x18] sm:$0xff] }
 0x323   : > { %v303_v36 = vld [vmem:[%s2305_s5 + $0x38] sm:$0xff] }
 0x325   : > { %v752_v18 = vpop.xlane.xlu0 %751 }
 0x326   : > { %v756_v19 = vpop.xlane.xlu1 %755  ;;  %v781_v43 = vsel %vm779_vm15, %v778_v41, %v752_v18 }
 0x329   : > { %v714_v20 = vpop.xlane.xlu0 %713 }
 0x32a   : > { %v768_v21 = vsel %vm767_vm10, %v714_v20, %v721_v7  ;;  %v763_v22 = vpop.xlane.xlu1 %762  ;;  %v300_v20 = vld [vmem:[%s2305_s5 + $0x20] sm:$0xff] }
 0x32b   : > { %v771_v31 = vsel %vm770_vm11, %v768_v21, %v728_v9  ;;  %v297_v9 = vld [vmem:[%s2305_s5 + $0x8] sm:$0xff] }
 0x32c   : > { %v774_v32 = vsel %vm773_vm12, %v771_v31, %v735_v13  ;;  %v301_v21 = vld [vmem:[%s2305_s5 + $0x28] sm:$0xff] }
 0x32d   : > { %v759_v34 = vpop.xlane.xlu0 %758  ;;  %v777_v35 = vsel %vm776_vm13, %v774_v32, %v742_v15  ;;  %v1546_v15 = vpack.c.bf16 %v297_v9, %v296_v8  ;;  %v1554_v32 = vpack.c.bf16 %v301_v21, %v300_v20 }
 0x32e   : > { %v487_v37 = vpop.permute.xlu1 %486  ;;  %v780_v39 = vsel %vm779_vm15, %v777_v35, %v749_v17  ;;  %v784_v45 = vsel %vm782_vm14, %v781_v43, %v759_v34  ;;  %v302_v35 = vld [vmem:[%s2305_s5 + $0x30] sm:$0xff] }
 0x32f   : > { %v783_v42 = vsel %vm782_vm14, %v780_v39, %v756_v19  ;;  %v534_v50 = vmul.f32 %v487_v37, %v2045_v40  ;;  %v1550_v19 = vpack.c.bf16 %v299_v16, %v298_v11  ;;  %1547 = vmatprep.subr.bf16.mxu0 %v1546_v15  ;;  %v1558_v41 = vpack.c.bf16 %v303_v36, %v302_v35  ;;  %v306_v43 = vld [vmem:[%s2305_s5 + $0x50] sm:$0xff] }
 0x330   : > { %v786_v44 = vsel %vm785_vm1, %v783_v42, %v763_v22  ;;  %v305_v42 = vld [vmem:[%s2305_s5 + $0x48] sm:$0xff] }
 0x331   : > { %1412 = vmatprep.mubr.msk.f32.mxu0 %vm788_vm2, %v786_v44  ;;  %v766_v46 = vpop.xlane.xlu0 %765  ;;  %v307_v44 = vld [vmem:[%s2305_s5 + $0x58] sm:$0xff] }
 0x332   : > { %v787_v47 = vsel %vm785_vm1, %v784_v45, %v766_v46  ;;  %v491_v48 = vpop.permute.xlu1 %490  ;;  %v308_v45 = vld [vmem:[%s2305_s5 + $0x60] sm:$0xff]  ;;  %v1566_v46 = vpack.c.bf16 %v307_v44, %v306_v43 }
 0x333   : > { %1413 = vmatmul.mubr.msk.f32.vlgmr.msra.gmra.mrb[0].mxu0 %vm788_vm2, %v787_v47  ;;  %v536_v53 = vmul.f32 %v491_v48, %v2045_v40  ;;  %v309_v47 = vld [vmem:[%s2305_s5 + $0x68] sm:$0xff] }
 0x334   : > { %1549 = vmatpush3.bf16.msra.mxu0 %v1546_v15  ;;  %v1570_v48 = vpack.c.bf16 %v309_v47, %v308_v45 }
 0x335   : > { %v489_v49 = vpop.permute.xlu0 %488  ;;  %1551 = vmatprep.subr.bf16.mxu0 %v1550_v19 }
 0x336   : > { %v535_v51 = vmul.f32 %v489_v49, %v2043_v38  ;;  %v493_v52 = vpop.permute.xlu1 %492  ;;  %v310_v49 = vld [vmem:[%s2305_s5 + $0x70] sm:$0xff] }
 0x337   : > { %v537_v54 = vmul.f32 %v493_v52, %v2043_v38 }
 0x338   : > { %v1694_v55 = vpack.i.bf16 %v535_v51, %v534_v50  ;;  %1553 = vmatpush3.bf16.msra.mxu0 %v1550_v19  ;;  %v311_v50 = vld [vmem:[%s2305_s5 + $0x78] sm:$0xff] }
 0x339   : > { %v1699_v56 = vpack.i.bf16 %v537_v54, %v536_v53  ;;  %v495_v57 = vpop.permute.xlu0 %494  ;;  %1555 = vmatprep.subr.bf16.mxu0 %v1554_v32  ;;  %v1574_v51 = vpack.c.bf16 %v311_v50, %v310_v49 }
 0x33a   : > { %v538_v60 = vmul.f32 %v495_v57, %v2045_v40  ;;  %v497_v61 = vpop.permute.xlu1 %496  ;;  %1695 = vrot.lane.b32.xlu0 %v1694_v55, %s1808_s19 }
 0x33b   : > { %v539_v62 = vmul.f32 %v497_v61, %v2043_v38  ;;  %1700 = vrot.lane.b32.xlu1 %v1699_v56, %s1808_s19 }
 0x33c   : > { %1557 = vmatpush3.bf16.msra.mxu0 %v1554_v32 }
 0x33d   : > { %v1704_v63 = vpack.i.bf16 %v539_v62, %v538_v60  ;;  %v499_v0 = vpop.permute.xlu0 %498  ;;  %1559 = vmatprep.subr.bf16.mxu0 %v1558_v41 }
 0x33e   : > { %v540_v1 = vmul.f32 %v499_v0, %v2045_v40  ;;  %v501_v2 = vpop.permute.xlu1 %500 }
 0x33f   : > { %v541_v3 = vmul.f32 %v501_v2, %v2043_v38  ;;  %1705 = vrot.lane.b32.xlu0 %v1704_v63, %s1808_s19 }
 0x340   : > { %1561 = vmatpush3.bf16.msra.mxu0 %v1558_v41 }
 0x341   : > { %v1709_v4 = vpack.i.bf16 %v541_v3, %v540_v1  ;;  %v503_v6 = vpop.permute.xlu0 %502 }
 0x342   : > { %v542_v24 = vmul.f32 %v503_v6, %v2045_v40  ;;  %v505_v25 = vpop.permute.xlu1 %504 }
 0x343   : > { %v543_v26 = vmul.f32 %v505_v25, %v2043_v38  ;;  %1710 = vrot.lane.b32.xlu1 %v1709_v4, %s1808_s19 }
 0x345   : > { %v1714_v27 = vpack.i.bf16 %v543_v26, %v542_v24  ;;  %v507_v28 = vpop.permute.xlu0 %506 }
 0x346   : > { %v544_v29 = vmul.f32 %v507_v28, %v2045_v40  ;;  %v509_v5 = vpop.permute.xlu1 %508 }
 0x347   : > { %v545_v7 = vmul.f32 %v509_v5, %v2043_v38  ;;  %1715 = vrot.lane.b32.xlu0 %v1714_v27, %s1808_s19 }
 0x349   : > { %v1719_v13 = vpack.i.bf16 %v545_v7, %v544_v29  ;;  %v511_v14 = vpop.permute.xlu0 %510 }
 0x34a   : > { %v546_v17 = vmul.f32 %v511_v14, %v2045_v40  ;;  %v513_v18 = vpop.permute.xlu1 %512 }
 0x34b   : > { %v547_v22 = vmul.f32 %v513_v18, %v2043_v38  ;;  %1720 = vrot.lane.b32.xlu1 %v1719_v13, %s1808_s19 }
 0x34d   : > { %v1724_v31 = vpack.i.bf16 %v547_v22, %v546_v17  ;;  %v515_v23 = vpop.permute.xlu0 %514 }
 0x34e   : > { %v548_v33 = vmul.f32 %v515_v23, %v2045_v40  ;;  %v517_v34 = vpop.permute.xlu1 %516  ;;  %v304_v40 = vld [vmem:[%s2305_s5 + $0x40] sm:$0xff] }
 0x34f   : > { %v549_v37 = vmul.f32 %v517_v34, %v2043_v38  ;;  %1725 = vrot.lane.b32.xlu0 %v1724_v31, %s1808_s19  ;;  %v1562_v38 = vpack.c.bf16 %v305_v42, %v304_v40 }
 0x351   : > { %v1729_v39 = vpack.i.bf16 %v549_v37, %v548_v33  ;;  %1563 = vmatprep.subr.bf16.mxu0 %v1562_v38 }
 0x352   : > { %1565 = vmatpush3.bf16.msra.mxu0 %v1562_v38 }
 0x353   : > { %1730 = vrot.lane.b32.xlu1 %v1729_v39, %s1808_s19  ;;  %1567 = vmatprep.subr.bf16.mxu0 %v1566_v46  ;;  %v1176_v39 = vstv %s1175_s30 }
 0x356   : > { %1569 = vmatpush3.bf16.msra.mxu0 %v1566_v46 }
 0x357   : > { %1571 = vmatprep.subr.bf16.mxu0 %v1570_v48 }
 0x35a   : > { %1573 = vmatpush3.bf16.msra.mxu0 %v1570_v48 }
 0x35b   : > { %1575 = vmatprep.subr.bf16.mxu0 %v1574_v51 }
 0x35e   : > { %1577 = vmatpush3.bf16.msra.mxu0 %v1574_v51 }
 0x35f   : > { %1450 = vmatprep.subr.mxu0 %v2132_v30 }
 0x3ac   : > { %v1696_v60 = vpop.permute.xlu0 %1695 }
 0x3ad   : > { %v1698_v61 = vunpack.i.h.bf16 %v1696_v60  ;;  %v1697_v62 = vunpack.i.l.bf16 %v1696_v60  ;;  %v1701_v2 = vpop.permute.xlu1 %1700 }
 0x3ae   : > { %v1702_v3 = vunpack.i.l.bf16 %v1701_v2 }
 0x3af   : > { %v1578_v1 = vpack.c.bf16 %v1698_v61, %v1697_v62 }
 0x3b1   : > { %v1706_v4 = vpop.permute.xlu0 %1705 }
 0x3b2   : > { %v1708_v25 = vunpack.i.h.bf16 %v1706_v4  ;;  %v1707_v26 = vunpack.i.l.bf16 %v1706_v4 }
 0x3b4   : > { %v1586_v28 = vpack.c.bf16 %v1708_v25, %v1707_v26 }
 0x3b5   : > { %v1711_v27 = vpop.permute.xlu1 %1710 }
 0x3b6   : > { %v1713_v29 = vunpack.i.h.bf16 %v1711_v27 }
 0x3b9   : > { %v1716_v5 = vpop.permute.xlu0 %1715 }
 0x3ba   : > { %v1718_v8 = vunpack.i.h.bf16 %v1716_v5  ;;  %v1717_v9 = vunpack.i.l.bf16 %v1716_v5 }
 0x3bc   : > { %v1594_v13 = vpack.c.bf16 %v1718_v8, %v1717_v9 }
 0x3bd   : > { %v1721_v11 = vpop.permute.xlu1 %1720 }
 0x3be   : > { %v1723_v14 = vunpack.i.h.bf16 %v1721_v11  ;;  %v1722_v15 = vunpack.i.l.bf16 %v1721_v11 }
 0x3c0   : > { %v1598_v17 = vpack.c.bf16 %v1723_v14, %v1722_v15 }
 0x3c1   : > { %v1726_v16 = vpop.permute.xlu0 %1725 }
 0x3c2   : > { %v1728_v18 = vunpack.i.h.bf16 %v1726_v16  ;;  %v1727_v19 = vunpack.i.l.bf16 %v1726_v16 }
 0x3c4   : > { %v1602_v21 = vpack.c.bf16 %v1728_v18, %v1727_v19 }
 0x3c5   : > { %v1731_v20 = vpop.permute.xlu1 %1730 }
 0x3c6   : > { %v1733_v22 = vunpack.i.h.bf16 %v1731_v20  ;;  %v1732_v31 = vunpack.i.l.bf16 %v1731_v20 }
 0x3c8   : > { %v1606_v23 = vpack.c.bf16 %v1733_v22, %v1732_v31 }
 0x406   : > { %v1414_v52 = vpop.f32.mrb[0].mxu0 }
 0x407   : > { %v871_v53 = vsub.f32 %v2105_v58, %v1414_v52  ;;  %v861_v54 = vpop.f32.mrb[1].mxu0  ;;  %v1703_v58 = vunpack.i.h.bf16 %v1701_v2 }
 0x408   : > { %v870_v55 = vsub.f32 %v2107_v59, %v861_v54 }
 0x409   : > { %v874_v56 = vmul.f32 1.442695, %v871_v53  ;;  %v1582_v24 = vpack.c.bf16 %v1703_v58, %v1702_v3 }
 0x40a   : > { %v872_v57 = vmul.f32 1.442695, %v870_v55 }
 0x40c   : > { %1734 = vpow2.f32 %v872_v57 }
 0x40d   : > { %1736 = vpow2.f32 %v874_v56 }
 0x416   : > { %v1735_v63 = vpop.eup %1734 }
 0x417   : > { %v1737_v0 = vpop.eup %1736  ;;  %1447 = vmatprep.mubr.f32.mxu0 %v1735_v63 }
 0x418   : > { %1448 = vmatmul.mubr.f32.vlgmr.msra.gmra.mrb[2].mxu0 %v1737_v0 }
 0x419   : > { %1451 = vmatpush3.msra.mxu0 %v2132_v30  ;;  %v1712_v30 = vunpack.i.l.bf16 %v1711_v27 }
 0x41a   : > { %1579 = vmatprep.subr.bf16.mxu0 %v1578_v1 }
 0x41b   : > { %v1590_v7 = vpack.c.bf16 %v1713_v29, %v1712_v30 }
 0x4eb   : > { %v1449_v59 = vpop.f32.mrb[2].mxu0 }
 0x4ec   : > { %v942_v6 = vpop.f32.mrb[3].mxu0 }
 0x4ed   : > { %1452 = vmatprep.mubr.msk.f32.mxu0 %vm788_vm2, %v942_v6 }
 0x4ee   : > { %1453 = vmatmul.mubr.msk.f32.vlgmr.msra.gmra.mrb[4].mxu0 %vm788_vm2, %v1449_v59 }
 0x4ef   : > { %1581 = vmatpush3.bf16.msra.mxu0 %v1578_v1 }
 0x4f0   : > { %1583 = vmatprep.subr.bf16.mxu0 %v1582_v24 }
 0x4f3   : > { %1585 = vmatpush3.bf16.msra.mxu0 %v1582_v24 }
 0x4f4   : > { %1587 = vmatprep.subr.bf16.mxu0 %v1586_v28 }
 0x4f7   : > { %1589 = vmatpush3.bf16.msra.mxu0 %v1586_v28 }
 0x4f8   : > { %1591 = vmatprep.subr.bf16.mxu0 %v1590_v7 }
 0x4fb   : > { %1593 = vmatpush3.bf16.msra.mxu0 %v1590_v7 }
 0x4fc   : > { %1595 = vmatprep.subr.bf16.mxu0 %v1594_v13 }
 0x4ff   : > { %1597 = vmatpush3.bf16.msra.mxu0 %v1594_v13 }
 0x500   : > { %1599 = vmatprep.subr.bf16.mxu0 %v1598_v17 }
 0x503   : > { %1601 = vmatpush3.bf16.msra.mxu0 %v1598_v17 }
 0x504   : > { %1603 = vmatprep.subr.bf16.mxu0 %v1602_v21 }
 0x507   : > { %1605 = vmatpush3.bf16.msra.mxu0 %v1602_v21 }
 0x508   : > { %1607 = vmatprep.subr.bf16.mxu0 %v1606_v23 }
 0x50b   : > { %1609 = vmatpush3.bf16.msra.mxu0 %v1606_v23 }
 0x5c1   : > { %v1454_v32 = vpop.f32.mrb[4].mxu0 }
 0x5c2   : > { %1738 = vrcp.f32 %v1454_v32  ;;  %v1023_v33 = vpop.f32.mrb[5].mxu0 }
 0x5c3   : > { %1740 = vrcp.f32 %v1023_v33 }
 0x5cc   : > { %v1739_v34 = vpop.eup %1738 }
 0x5cd   : > { %v1741_v35 = vpop.eup %1740  ;;  %v1035_v37 = vmul.f32 %v1739_v34, %v1737_v0 }
 0x5ce   : > { %v1033_v36 = vmul.f32 %v1741_v35, %v1735_v63 }
 0x5d0   : > { %1487 = vmatprep.mubr.f32.mxu0 %v1033_v36 }
 0x5d1   : > { %1488 = vmatmul.mubr.f32.vlgmr.msra.gmra.mrb[6].mxu0 %v1035_v37 }
 0x6a4   : > { %v1489_v41 = vpop.f32.mrb[6].mxu0 }
 0x6a5   : > { %v1178_v40 = vmul.f32 %v1489_v41, %v1176_v39  ;;  %v1166_v42 = vpop.f32.mrb[7].mxu0 }
 0x6a6   : > { %v1177_v38 = vmul.f32 %v1176_v39, %v1166_v42 }
 0x6a7   : > { %v1180_v43 = vadd.f32 %v1178_v40, %v1957_v12 }
 0x6a8   : > { %v1179_v44 = vadd.f32 %v1177_v38, %v1944_v10 }
 0x6a9   : > { %1182 = vst.msk [vmem:[%s272_s14 + $0x8] sm:$0xff] %vm324_vm0, %v1180_v43 }
 0x6aa   : > { %1181 = vst.msk [vmem:[%s272_s14] sm:$0xff] %vm324_vm0, %v1179_v44 }
 0x6ab   : > { %1755 = shalt.err (!%p1752_p3)
}
 0x6ac   : > { %s1756_s23 = scalar_lea.hbm %s2252_s18, 256  ;;  %s1760_s9 = scalar_lea.hbm %s2307_s7, 512 }
 0x6ad   : > { %p1757_p4 = scmp.ne.s32.totalorder %s2252_s18, %s1756_s23  ;;  %p1761_p9 = scmp.lt.u32.totalorder %s2252_s18, %s2307_s7 }
 0x6ae   : > { %p1762_p10 = scmp.lt.u32.totalorder %s1760_s9, %s1756_s23  ;;  %p1764_p12 = scmp.lt.u32.totalorder %s1756_s23, %s2252_s18 }
 0x6af   : > { %p1758_p7 = pnand %p1757_p4, %p1893_p5 }
 0x6b0   : > { %p1763_p11 = por %p1762_p10, %p1761_p9 }
 0x6b1   : > { %p1759_p8 = pneg %p1758_p7 }
 0x6b2   : > { %p1765_p13 = por %p1764_p12, %p1763_p11 }
 0x6b4   : > { %p1766_p0 = pnand %p1765_p13, %p1759_p8 }
 0x6b6   : > { %1769 = shalt.err (!%p1766_p0)
}
 0x6b7   : > { %s1810_s16 = smov 128   ;;  %s1811_s17 = smov 8  }
 0x6b8   : > { %1610 = dma.vmem_to_hbm [thread:$0]  (%p1893_p5), %s2254_s15, 256, %s2252_s18, %s2259_s0, %s1810_s16, %s1810_s16, %s1811_s17  }
 0x6b9 PF: > { %p1616_p1 = scmp.ge.s32.totalorder %s1804_s29, 2  ;;  %s1212_s19 = sand.u32 1, %s1792_s26  }
 0x6ba   : > { %s1213_s25 = scalar_lea.sflag [#allocation4], %s1212_s19 }
 0x6bb   : > { %p1613_p2 = pnand %p1616_p1, %p1897_p6 }
 0x6bd   : > { %1787 = dma.done.wait (!%p1613_p2), %s1213_s25, 256  }
 0x6be   : > { %1789 = vsyncadd (!%p1613_p2), %s1213_s25, 4294967040  ;;  %p18_p3 = scmp.ge.s32.totalorder %s1880_s8, 4   ;;  %s2312_s26 = smov %s1796_s27 }
 0x6bf   : > { %s2313_s27 = smov %s1800_s28  ;;  %s2314_s28 = smov %s1891_s11 }
 0x6c0   : > { %s2315_s29 = smov %s1880_s8  ;;  %20 = sbr.rel (!%p18_p3) target bundleno = 5 (0x5), region = 83 }
 0x6c7   :  { %1218 = vsyncpa [#allocation4], 1 }
 0x6c8   :  { %1220 = vsyncpa [#allocation4 + $0x1], 1 }

</bundles_post_ra>
